<compile_context>
chip_gen: v7x
topology: tpu7x:2x2x1
jax: 0.10.0
libtpu: 0.0.40
codegen_flags: <defaults>
</compile_context>

<pallas_src>
import numpy as np
import jax
import jax.numpy as jnp
from jax.experimental import pallas as pl
from jax.experimental.pallas import tpu as pltpu


def _td_cap_for_device():
    """Lane-tile cap: 8192 on v7x (3.2 TB/s HBM wants bigger steps), else 4096."""
    cap = 4096
    try:
        kind = jax.devices()[0].device_kind.lower()
        if "v7" in kind or "7x" in kind or "tpu7" in kind:
            cap = 8192
    except Exception:
        pass
    return cap


def _make_mse_rowsum_kernel(D, TD, kps, has_mask):
    """Per-row sum of ((x - y) * mask)^2, accumulated over the last grid axis."""
    need_tail = (D % TD) != 0  # only when D > TD cap and ragged

    def kernel(*refs):
        if has_mask:
            x_ref, y_ref, m_ref, o_ref = refs
        else:
            x_ref, y_ref, o_ref = refs

        k = pl.program_id(2)

        @pl.when(k == 0)
        def _init():
            o_ref[...] = jnp.zeros_like(o_ref)

        d = x_ref[...].astype(jnp.float32) - y_ref[...].astype(jnp.float32)
        if has_mask:
            # m_ref block is (TB, TD) or (1, TD); jnp broadcasting handles both.
            d = d * m_ref[...].astype(jnp.float32)
        if need_tail:
            # Zero the out-of-bounds lanes of the ragged last block (their HBM/VMEM
            # contents are unspecified since we do not pad on the host).
            g = pl.program_id(0) * kps + k  # global D-block index
            col = jax.lax.broadcasted_iota(jnp.int32, d.shape, 1) + g * TD
            d = jnp.where(col < D, d, 0.0)

        o_ref[...] = o_ref[...] + jnp.sum(d * d, axis=1, keepdims=True)[None]

    return kernel


def torch_loss_mse(x, y, mask=1.0, sample_weight=1.0, reduction="mean",
                   channel_dim=1):
    """Equivalent of TorchLoss(nn.MSELoss, reduction=..., channel_dim=...)(x, y, mask, sample_weight).

    Note: for an elementwise loss followed by a mean over all non-batch dims, the
    channel_dim transpose does not change the result, so it is a no-op here.
    """
    del channel_dim  # no-op for MSE + full feature mean
    x = jnp.asarray(x)
    y = jnp.asarray(y)
    B = x.shape[0]
    D = int(np.prod(x.shape[1:])) if x.ndim > 1 else 1

    xf = jnp.reshape(x, (B, D))   # contiguous reshape: free, no HBM copy
    yf = jnp.reshape(y, (B, D))

    # ---- mask classification (avoid materializing broadcast masks) -------------
    mask = jnp.asarray(mask)
    if not jnp.issubdtype(mask.dtype, jnp.floating):
        mask = mask.astype(jnp.float32)

    scalar_scale = None     # scalar m^2, applied in epilogue
    row_scale = None        # per-sample m_b^2, applied in epilogue
    mask_operand = None     # streamed mask, shape (1, D) or (B, D)
    mask_rows = 0

    if mask.ndim == 0 or mask.size == 1:
        scalar_scale = jnp.reshape(mask, ()).astype(jnp.float32) ** 2
    else:
        ms = (1,) * (x.ndim - mask.ndim) + tuple(mask.shape)
        batch_ext = ms[0]
        feat_all_one = all(s == 1 for s in ms[1:])
        if batch_ext == 1 and x.ndim > 1:
            # Feature-only mask: stream one compact (1, D) row, broadcast in-kernel.
            mask_operand = jnp.reshape(
                jnp.broadcast_to(jnp.reshape(mask, ms), (1,) + tuple(x.shape[1:])),
                (1, D))
            mask_rows = 1
        elif feat_all_one:
            # Per-sample mask: fold in as a per-row scale, no HBM stream.
            row_scale = jnp.reshape(mask, (B,)).astype(jnp.float32) ** 2
        else:
            # Fully elementwise (or mixed) mask: full (B, D) stream, native dtype.
            mask_operand = jnp.reshape(jnp.broadcast_to(mask, x.shape), (B, D))
            mask_rows = -1  # marker: TB rows

    # ---- tiling ----------------------------------------------------------------
    td_cap = _td_cap_for_device()
    TD = D if D <= td_cap else td_cap            # == full dim, or a multiple of 128
    d_blocks = -(-D // TD)

    if B <= 128:
        TB = B                                    # block dim == full array dim: legal
        row_blocks = 1
    else:
        TB = 128                                  # multiple of 8/16/32 sublane tiles
        row_blocks = -(-B // 128)

    # v7x megacore: if the row axis has a single block, split the D range across a
    # leading parallel axis so both TensorCores get work (harmless on v5e/v6e).
    nsplit = 2 if (row_blocks == 1 and d_blocks >= 2 and d_blocks % 2 == 0) else 1
    kps = d_blocks // nsplit                      # k-blocks per split

    # ---- specs, cost estimate, VMEM budget --------------------------------------
    def _xy_map(s, i, k):
        return (i, s * kps + k)

    xy_spec = pl.BlockSpec((TB, TD), _xy_map)
    operands = [xf, yf]
    in_specs = [xy_spec, xy_spec]
    if mask_operand is not None:
        operands.append(mask_operand)
        if mask_rows == 1:
            in_specs.append(pl.BlockSpec((1, TD), lambda s, i, k: (0, s * kps + k)))
        else:
            in_specs.append(xy_spec)

    out_spec = pl.BlockSpec((1, TB, 1), lambda s, i, k: (s, i, 0))

    bytes_accessed = sum(int(op.size) * op.dtype.itemsize for op in operands)
    bytes_accessed += nsplit * B * 4
    flops = (4 if mask_operand is not None else 3) * B * D
    cost = pl.CostEstimate(flops=int(flops), transcendentals=0,
                           bytes_accessed=int(bytes_accessed))

    bufs = 2 * TB * TD * (xf.dtype.itemsize + yf.dtype.itemsize)
    if mask_operand is not None:
        mrows = 1 if mask_rows == 1 else TB
        bufs += 2 * mrows * TD * mask_operand.dtype.itemsize
    bufs += 2 * TB * 4
    vmem_limit = int(min(64 << 20, max(32 << 20, bufs + (16 << 20))))

    kernel = _make_mse_rowsum_kernel(D=D, TD=TD, kps=kps,
                                     has_mask=(mask_operand is not None))

    partial = pl.pallas_call(
        kernel,
        out_shape=jax.ShapeDtypeStruct((nsplit, B, 1), jnp.float32),
        grid=(nsplit, row_blocks, kps),
        in_specs=in_specs,
        out_specs=out_spec,
        compiler_params=pltpu.CompilerParams(
            dimension_semantics=("parallel", "parallel", "arbitrary"),
            vmem_limit_bytes=vmem_limit),
        cost_estimate=cost,
    )(*operands)

    # ---- tiny XLA epilogue -------------------------------------------------------
    per_sample_sum = jnp.sum(partial[:, :, 0], axis=0)        # (B,)
    if scalar_scale is not None:
        per_sample_sum = per_sample_sum * scalar_scale
    if row_scale is not None:
        per_sample_sum = per_sample_sum * row_scale

    res = (per_sample_sum / jnp.float32(D)) * jnp.asarray(sample_weight, jnp.float32)

    if reduction == "none":
        return res
    if reduction == "sum":
        return jnp.sum(res)
    return jnp.mean(res)


def _reference(x, y, mask, sample_weight, reduction="mean"):
    m = jnp.asarray(mask, jnp.float32)
    xm = jnp.asarray(x, jnp.float32) * m
    ym = jnp.asarray(y, jnp.float32) * m
    res = (xm - ym) ** 2
    if res.ndim > 1:
        res = res.mean(axis=tuple(range(1, res.ndim)))
    res = res * jnp.asarray(sample_weight, jnp.float32)
    if reduction == "none":
        return res
    if reduction == "sum":
        return jnp.sum(res)
    return jnp.mean(res)


if __name__ == "__main__":
    key = jax.random.PRNGKey(0)
    keys = jax.random.split(key, 8)

    B, C, H, W = 2, 4, 16, 16
    x = jax.random.normal(keys[0], (B, C, H, W), dtype=jnp.float32)
    y = jax.random.normal(keys[1], (B, C, H, W), dtype=jnp.float32)
    mask_full = (jax.random.uniform(keys[2], (B, C, H, W)) > 0.2).astype(jnp.float32)
    sw = jax.random.uniform(keys[3], (B,), dtype=jnp.float32) + 0.5

    # 1) Fully elementwise mask, f32.
    out = jax.block_until_ready(torch_loss_mse(x, y, mask_full, sw))
    ref = _reference(x, y, mask_full, sw)
    np.testing.assert_allclose(np.asarray(out), np.asarray(ref), rtol=1e-5, atol=1e-6)

    # 2) Scalar-mask fast path (no mask stream), bf16 inputs in native dtype.
    xb, yb = x.astype(jnp.bfloat16), y.astype(jnp.bfloat16)
    out = jax.block_until_ready(torch_loss_mse(xb, yb, 1.0, sw))
    ref = _reference(xb, yb, 1.0, sw)
    np.testing.assert_allclose(np.asarray(out), np.asarray(ref), rtol=1e-2, atol=1e-3)

    # 3) Compact per-channel mask (streamed as a single (1, D) row).
    mask_c = jax.random.uniform(keys[4], (1, C, 1, 1), dtype=jnp.float32)
    out = jax.block_until_ready(torch_loss_mse(x, y, mask_c, sw))
    ref = _reference(x, y, mask_c, sw)
    np.testing.assert_allclose(np.asarray(out), np.asarray(ref), rtol=1e-5, atol=1e-6)

    # 4) Per-sample mask (folded in the epilogue) with reduction='none'.
    mask_b = jax.random.uniform(keys[5], (B, 1, 1, 1), dtype=jnp.float32)
    out = jax.block_until_ready(torch_loss_mse(x, y, mask_b, sw, reduction="none"))
    ref = _reference(x, y, mask_b, sw, reduction="none")
    np.testing.assert_allclose(np.asarray(out), np.asarray(ref), rtol=1e-5, atol=1e-6)

    # 5) Unaligned B and D (3, 5, 7, 11) with a full mask, no host-side padding.
    x5 = jax.random.normal(keys[6], (3, 5, 7, 11), dtype=jnp.float32)
    y5 = jax.random.normal(keys[7], (3, 5, 7, 11), dtype=jnp.float32)
    m5 = (x5 > -0.5).astype(jnp.float32)
    out = jax.block_until_ready(torch_loss_mse(x5, y5, m5, 1.0, reduction="sum"))
    ref = _reference(x5, y5, m5, 1.0, reduction="sum")
    np.testing.assert_allclose(np.asarray(out), np.asarray(ref), rtol=1e-4, atol=1e-5)

    # 6) Multi k-block D (exercises the D-split parallel axis for megacore).
    x6 = jax.random.normal(keys[0], (2, 8, 32, 64), dtype=jnp.float32)
    y6 = jax.random.normal(keys[1], (2, 8, 32, 64), dtype=jnp.float32)
    out = jax.block_until_ready(torch_loss_mse(x6, y6, 1.0, 1.0))
    ref = _reference(x6, y6, 1.0, 1.0)
    np.testing.assert_allclose(np.asarray(out), np.asarray(ref), rtol=1e-4, atol=1e-6)

    # 7) Multi k-block with a ragged tail (D % TD != 0) and an elementwise mask.
    x7 = jax.random.normal(keys[2], (4, 9000), dtype=jnp.float32)
    y7 = jax.random.normal(keys[3], (4, 9000), dtype=jnp.float32)
    m7 = (jax.random.uniform(keys[4], (4, 9000)) > 0.1).astype(jnp.float32)
    out = jax.block_until_ready(torch_loss_mse(x7, y7, m7, 1.0))
    ref = _reference(x7, y7, m7, 1.0)
    np.testing.assert_allclose(np.asarray(out), np.asarray(ref), rtol=1e-4, atol=1e-6)

    print("KERNEL_OK")
</pallas_src>

<mosaic_0001>
module attributes {stable_mosaic.version = 11 : i64} {
  func.func @kernel(%arg0: i32, %arg1: i32, %arg2: i32, %arg3: memref<2x1024xf32, #tpu.memory_space<vmem>>, %arg4: memref<2x1024xf32, #tpu.memory_space<vmem>>, %arg5: memref<2x1024xf32, #tpu.memory_space<vmem>>, %arg6: memref<1x2x1xf32, #tpu.memory_space<vmem>>) attributes {dimension_semantics = [#tpu.dimension_semantics<parallel>, #tpu.dimension_semantics<parallel>, #tpu.dimension_semantics<arbitrary>], iteration_bounds = array<i64: 1, 1, 1>, scalar_prefetch = 0 : i64, scratch_operands = 0 : i64, tpu.core_type = #tpu.core_type<tc>, window_params = [{transform_indices = @transform_0, window_bounds = array<i64: 2, 1024>}, {transform_indices = @transform_1, window_bounds = array<i64: 2, 1024>}, {transform_indices = @transform_2, window_bounds = array<i64: 2, 1024>}, {transform_indices = @transform_3, window_bounds = array<i64: 1, 2, 1>}]} {
    %c0_i32 = arith.constant 0 : i32
    %0 = arith.cmpi eq, %arg2, %c0_i32 : i32
    %1 = arith.extui %0 : i1 to i32
    %c0_i32_0 = arith.constant 0 : i32
    %2 = arith.cmpi ne, %1, %c0_i32_0 : i32
    scf.if %2 {
      %cst_12 = arith.constant 0.000000e+00 : f32
      %15 = vector.broadcast %cst_12 : f32 to vector<1x2x1xf32>
      %c0_13 = arith.constant 0 : index
      %c0_14 = arith.constant 0 : index
      %c0_15 = arith.constant 0 : index
      %16 = vector.load %arg6[%c0_13, %c0_14, %c0_15] : memref<1x2x1xf32, #tpu.memory_space<vmem>>, vector<1x2x1xf32>
      tpu.vector_store %arg6[%c0_13, %c0_14, %c0_15], %15 {strides = array<i32>} : memref<1x2x1xf32, #tpu.memory_space<vmem>>, vector<1x2x1xf32>,
    } else {
    }
    %c0 = arith.constant 0 : index
    %c0_1 = arith.constant 0 : index
    %3 = vector.load %arg3[%c0, %c0_1] : memref<2x1024xf32, #tpu.memory_space<vmem>>, vector<2x1024xf32>
    %c0_2 = arith.constant 0 : index
    %c0_3 = arith.constant 0 : index
    %4 = vector.load %arg4[%c0_2, %c0_3] : memref<2x1024xf32, #tpu.memory_space<vmem>>, vector<2x1024xf32>
    %5 = arith.subf %3, %4 : vector<2x1024xf32>
    %c0_4 = arith.constant 0 : index
    %c0_5 = arith.constant 0 : index
    %6 = vector.load %arg5[%c0_4, %c0_5] : memref<2x1024xf32, #tpu.memory_space<vmem>>, vector<2x1024xf32>
    %7 = arith.mulf %5, %6 : vector<2x1024xf32>
    %c0_6 = arith.constant 0 : index
    %c0_7 = arith.constant 0 : index
    %c0_8 = arith.constant 0 : index
    %8 = vector.load %arg6[%c0_6, %c0_7, %c0_8] : memref<1x2x1xf32, #tpu.memory_space<vmem>>, vector<1x2x1xf32>
    %9 = arith.mulf %7, %7 : vector<2x1024xf32>
    %cst = arith.constant dense<0.000000e+00> : vector<2xf32>
    %10 = vector.multi_reduction <add>, %9, %cst [1] : vector<2x1024xf32> to vector<2xf32>
    %11 = vector.shape_cast %10 : vector<2xf32> to vector<2x1xf32>
    %12 = vector.shape_cast %11 : vector<2x1xf32> to vector<1x2x1xf32>
    %13 = arith.addf %8, %12 : vector<1x2x1xf32>
    %c0_9 = arith.constant 0 : index
    %c0_10 = arith.constant 0 : index
    %c0_11 = arith.constant 0 : index
    %14 = vector.load %arg6[%c0_9, %c0_10, %c0_11] : memref<1x2x1xf32, #tpu.memory_space<vmem>>, vector<1x2x1xf32>
    tpu.vector_store %arg6[%c0_9, %c0_10, %c0_11], %13 {strides = array<i32>} : memref<1x2x1xf32, #tpu.memory_space<vmem>>, vector<1x2x1xf32>,
    return
  }
  func.func @transform_0(%arg0: i32, %arg1: i32, %arg2: i32) -> (i32, i32) {
    %c1_i32 = arith.constant 1 : i32
    %0 = arith.muli %arg0, %c1_i32 : i32
    %1 = arith.addi %0, %arg2 : i32
    %c0_i32 = arith.constant 0 : i32
    return %arg1, %1 : i32, i32
  }
  func.func @transform_1(%arg0: i32, %arg1: i32, %arg2: i32) -> (i32, i32) {
    %c1_i32 = arith.constant 1 : i32
    %0 = arith.muli %arg0, %c1_i32 : i32
    %1 = arith.addi %0, %arg2 : i32
    %c0_i32 = arith.constant 0 : i32
    return %arg1, %1 : i32, i32
  }
  func.func @transform_2(%arg0: i32, %arg1: i32, %arg2: i32) -> (i32, i32) {
    %c1_i32 = arith.constant 1 : i32
    %0 = arith.muli %arg0, %c1_i32 : i32
    %1 = arith.addi %0, %arg2 : i32
    %c0_i32 = arith.constant 0 : i32
    return %arg1, %1 : i32, i32
  }
  func.func @transform_3(%arg0: i32, %arg1: i32, %arg2: i32) -> (i32, i32, i32) {
    %c0_i32 = arith.constant 0 : i32
    %c0_i32_0 = arith.constant 0 : i32
    return %arg0, %arg1, %c0_i32 : i32, i32, i32
  }
}

</mosaic_0001>

<bundles_post_ra>
// kernel: tpu_custom_call.1
= control target key start
LH: loop header
LB: loop body
LE: loop exit
PB: predicated region body
PF: predicated region fallthrough
CT: control target
= control target key end

     0   :  { %8 = vsyncpa [#allocation3], 0  ;;  %s312_s0 = inlined_call_operand.hbm [shape: f32[2,1024], index: 0, kind: input, shape index: {}]   ;;  %s313_s1 = inlined_call_operand.hbm [shape: f32[2,1024], index: 1, kind: input, shape index: {}]   ;;  %s314_s2 = inlined_call_operand.hbm [shape: f32[2,1024], index: 2, kind: input, shape index: {}]   ;;  %s315_s3 = inlined_call_operand.vmem [shape: f32[1,2,1], index: 3, kind: output, shape index: {}]  }
   0x1   :  { %9 = vsyncpa [#allocation5], 0  ;;  %s232_s12 = smov [#allocation4]   ;;  %s233_s14 = smov [#allocation2]  }
   0x2   :  { %s34_s13 = sshll.u32 %s232_s12, 4  ;;  %s20_s15 = sshll.u32 %s233_s14, 4  ;;  %s35_s13 = int_to_ptr.vmem [resolvable:$true] %s34_s13  ;;  %s21_s15 = int_to_ptr.vmem [resolvable:$true] %s20_s15 }
   0x3   :  { %s162_s18 = scalar_lea.hbm %s313_s1, 256 }
   0x4   :  { %p163_p0 = scmp.ne.s32.totalorder %s313_s1, %s162_s18  ;;  %p166_p1 = scmp.lt.u32.totalorder %s162_s18, %s313_s1 }
   0x6   :  { %p168_p2 = pnand %p166_p1, %p163_p0 }
   0x8   :  { %171 = shalt.err (!%p168_p2)
}
   0x9   :  { %s172_s23 = scalar_lea.vmem %s35_s13, 256  ;;  %p177_p4 = scmp.lt.s32.totalorder %s35_s13, %s35_s13 }
   0xa   :  { %p173_p3 = scmp.ne.s32.totalorder %s35_s13, %s172_s23  ;;  %p178_p5 = scmp.lt.s32.totalorder %s172_s23, %s172_s23 }
   0xc   :  { %p179_p6 = por %p178_p5, %p177_p4 }
   0xe   :  { %p180_p7 = pnand %p179_p6, %p173_p3 }
  0x10   :  { %183 = shalt.err (!%p180_p7)
}
  0x11   :  { %37 = dma.hbm_to_vmem [thread:$0]  %s313_s1, 256, %s35_s13, [#allocation5]  }
  0x12   :  { %s184_s28 = scalar_lea.hbm %s312_s0, 256 }
  0x13   :  { %p185_p8 = scmp.ne.s32.totalorder %s312_s0, %s184_s28  ;;  %p188_p9 = scmp.lt.u32.totalorder %s184_s28, %s312_s0 }
  0x15   :  { %p190_p10 = pnand %p188_p9, %p185_p8 }
  0x17   :  { %193 = shalt.err (!%p190_p10)
}
  0x18   :  { %s194_s6 = scalar_lea.vmem %s21_s15, 256  ;;  %p199_p12 = scmp.lt.s32.totalorder %s21_s15, %s21_s15 }
  0x19   :  { %p195_p11 = scmp.ne.s32.totalorder %s21_s15, %s194_s6  ;;  %p200_p13 = scmp.lt.s32.totalorder %s194_s6, %s194_s6 }
  0x1b   :  { %p201_p0 = por %p200_p13, %p199_p12 }
  0x1d   :  { %p202_p1 = pnand %p201_p0, %p195_p11 }
  0x1f   :  { %205 = shalt.err (!%p202_p1)
}
  0x20   :  { %23 = dma.hbm_to_vmem [thread:$0]  %s312_s0, 256, %s21_s15, [#allocation3]  }
  0x21   :  { %s234_s8 = smov [#allocation6]   ;;  %s206_s12 = scalar_lea.hbm %s314_s2, 256 }
  0x22   :  { %s48_s9 = sshll.u32 %s234_s8, 4  ;;  %p207_p2 = scmp.ne.s32.totalorder %s314_s2, %s206_s12  ;;  %s49_s9 = int_to_ptr.vmem [resolvable:$true] %s48_s9 }
  0x23   :  { %p210_p3 = scmp.lt.u32.totalorder %s206_s12, %s314_s2 }
  0x25   :  { %p212_p4 = pnand %p210_p3, %p207_p2 }
  0x27   :  { %215 = shalt.err (!%p212_p4)
}
  0x28   :  { %s216_s18 = scalar_lea.vmem %s49_s9, 256  ;;  %p221_p6 = scmp.lt.s32.totalorder %s49_s9, %s49_s9 }
  0x29   :  { %p217_p5 = scmp.ne.s32.totalorder %s49_s9, %s216_s18  ;;  %p222_p7 = scmp.lt.s32.totalorder %s216_s18, %s216_s18 }
  0x2b   :  { %p223_p8 = por %p222_p7, %p221_p6 }
  0x2d   :  { %p224_p9 = pnand %p223_p8, %p217_p5 }
  0x2f   :  { %227 = shalt.err (!%p224_p9)
}
  0x30   :  { %51 = dma.hbm_to_vmem [thread:$0]  %s314_s2, 256, %s49_s9, [#allocation5]  }
  0x31   :  { %228 = dma.done.wait [#allocation3], 256  }
  0x32   :  { %229 = vsyncadd [#allocation3], 4294967040 }
  0x33   :  { %230 = dma.done.wait [#allocation5], 512  }
  0x34   :  { %231 = vsyncadd [#allocation5], 4294966784  ;;  %vm71_vm0 = vcmask 1024   ;;  %v235_v0 = vmov 1983009808   ;;  %v92_v2 = vlaneseq  ;;  %v236_v3 = vmov 0.0  }
  0x35   :  { %v90_v1 = vunpack.c.l.s4 %v235_v0  ;;  %72 = vst.msk [vmem:[%s315_s3] sm:$0x3] %vm71_vm0, %v236_v3  ;;  %v73_v6 = vld [vmem:[#allocation2] sm:$0xff]  ;;  %v74_v7 = vld [vmem:[#allocation2 + $0x8] sm:$0xff]  ;;  %v75_v8 = vld [vmem:[#allocation4] sm:$0xff]  ;;  %vm130_vm1 = vcmask 1041408  }
  0x36   :  { %v93_v5 = vshrl.u32 %v92_v2, 7  ;;  %v76_v9 = vld [vmem:[#allocation4 + $0x8] sm:$0xff]  ;;  %v77_v10 = vsub.f32 %v73_v6, %v75_v8  ;;  %v79_v11 = vld [vmem:[#allocation6] sm:$0xff]  ;;  %v80_v12 = vld [vmem:[#allocation6 + $0x8] sm:$0xff] }
  0x37   :  { %v91_v4 = vunpack.c.0.s8 %v90_v1  ;;  %v78_v13 = vsub.f32 %v74_v7, %v76_v9 }
  0x38   :  { %v81_v14 = vmul.f32 %v79_v11, %v77_v10 }
  0x39   :  { %v94_v15 = vsub.s32 %v91_v4, %v93_v5  ;;  %v82_v16 = vmul.f32 %v80_v12, %v78_v13 }
  0x3a   :  { %v84_v17 = vmul.f32 %v81_v14, %v81_v14 }
  0x3b   :  { %v85_v18 = vmul.f32 %v82_v16, %v82_v16 }
  0x3c   :  { %v88_v19 = vcombine.high %v84_v17, %v84_v17  ;;  %v95_v20 = vrot.slane %v84_v17, %v94_v15  ;;  %v83_v44 = vld [vmem:[%s315_s3] sm:$0x3] }
  0x3d   :  { %v105_v21 = vcombine.high %v85_v18, %v85_v18  ;;  %v112_v24 = vrot.slane %v85_v18, %v94_v15 }
  0x3e   :  { %v102_v22 = vrot.slane %v88_v19, %v94_v15  ;;  %v103_v23 = vcombine.high %v95_v20, %v95_v20  ;;  %v131_v25 = vsel %vm130_vm1, %v95_v20, 0.0 }
  0x3f   :  { %v119_v30 = vrot.slane %v105_v21, %v94_v15  ;;  %v120_v31 = vcombine.high %v112_v24, %v112_v24  ;;  %v138_v34 = vsel %vm130_vm1, %v112_v24, 0.0 }
  0x40   :  { %v104_v26 = vcombine.high %v102_v22, %v102_v22  ;;  %v132_v27 = vsel %vm130_vm1, %v103_v23, 0.0  ;;  %v134_v28 = vsel %vm130_vm1, %v102_v22, 0.0 }
  0x41   :  { %v133_v29 = vadd.f32 %v132_v27, %v131_v25  ;;  %v121_v36 = vcombine.high %v119_v30, %v119_v30  ;;  %v140_v37 = vsel %vm130_vm1, %v120_v31, 0.0  ;;  %v142_v39 = vsel %vm130_vm1, %v119_v30, 0.0 }
  0x42   :  { %v136_v32 = vsel %vm130_vm1, %v104_v26, 0.0 }
  0x43   :  { %v135_v33 = vadd.f32 %v134_v28, %v133_v29  ;;  %v144_v41 = vsel %vm130_vm1, %v121_v36, 0.0 }
  0x45   :  { %v137_v35 = vadd.f32 %v136_v32, %v135_v33 }
  0x47   :  { %v139_v38 = vadd.f32 %v138_v34, %v137_v35 }
  0x49   :  { %v141_v40 = vadd.f32 %v140_v37, %v139_v38 }
  0x4b   :  { %v143_v42 = vadd.f32 %v142_v39, %v141_v40 }
  0x4d   :  { %v145_v43 = vadd.f32 %v144_v41, %v143_v42 }
  0x4f   :  { %146 = vadd.xlane.f32.xlu0 %v145_v43 }
  0xdc   :  { %v147_v45 = vpop.xlane.xlu0 %146 }
  0xdd   :  { %v148_v46 = vadd.f32 %v147_v45, %v83_v44 }
  0xdf   :  { %150 = vst.msk [vmem:[%s315_s3] sm:$0x3] %vm71_vm0, %v148_v46 }
  0xe0   :  { %155 = vsyncpa [#allocation3], 1 }
  0xe1   :  { %156 = vsyncpa [#allocation5], 1 }

</bundles_post_ra>
